<compile_context>
chip_gen: v5e
topology: v5e:2x2
jax: 0.10.0
libtpu: 0.0.40
codegen_flags: <defaults>
</compile_context>

<pallas_src>
import functools

import jax
import jax.numpy as jnp
import numpy as np
from jax.experimental import pallas as pl
from jax.experimental.pallas import tpu as pltpu

_EPS = 1e-5      # nn.BatchNorm2d default eps
_SLOPE = 0.01    # nn.LeakyReLU default negative_slope


# ----------------------------- compiler params --------------------------------

def _block_bytes(*specs):
    return sum(int(np.prod(s)) * np.dtype(d).itemsize for s, d in specs)


def _cparams(per_step_bytes):
    # Per-step working set (pipeline double-buffers every block) + generous
    # headroom, capped well below v7x's 64 MiB/TC physical VMEM (review: do not
    # claim all of it).  Far more than needed here; harmless on 128 MiB v5e/v6e.
    budget = int(min(48 * 2 ** 20, max(8 * 2 ** 20, 8 * per_step_bytes)))
    return pltpu.CompilerParams(
        dimension_semantics=("parallel",),     # batch-block axis -> megacore
        vmem_limit_bytes=budget,
    )


# ------------------------------- kernels ---------------------------------------

def _band_conv(xp_ref, w_ref, b_ref, mxu_dtype):
    """3x3 'same' conv on the lane-dense, H-padded scratch as 3 MXU matmuls.

    xp_ref : (B, Hc+2, Wc*Cin)   rows 0 and Hc+1 are the zero H-halo
    w_ref  : (3, Wc*Cin, Wc*Cout) block-banded weights, one per H offset
    b_ref  : (1, Wc*Cout)         lane-tiled bias
    returns (B*Hc, Wc*Cout) float32 (f32 accumulation regardless of mxu_dtype)
    """
    B, Hp, K = xp_ref.shape
    Hc = Hp - 2
    acc = None
    for di in range(3):                       # static unroll: 3 matmuls
        lhs = xp_ref[:, di:di + Hc, :].reshape(B * Hc, K).astype(mxu_dtype)
        part = jnp.dot(lhs, w_ref[di], preferred_element_type=jnp.float32)
        acc = part if acc is None else acc + part
    return acc + b_ref[...]


def _store_conv_block(acc, y_ref, st_ref):
    B, Hc, WC = y_ref.shape
    # lane-dense slab store: (B, Hc, Wc*Cout) — splitting (B*Hc) rows is free
    y_ref[...] = acc.reshape(B, Hc, WC)
    # ONE packed, lane-dense BN partial-stat output: row 0 = sum, row 1 = sumsq,
    # per (w, c) lane.  The host folds the Wc groups and the grid axis.
    s = jnp.sum(acc, axis=0, keepdims=True)
    q = jnp.sum(acc * acc, axis=0, keepdims=True)
    st_ref[...] = jnp.concatenate([s, q], axis=0).reshape(1, 2, WC)


def _pool_conv_kernel(mxu_dtype, x_ref, w_ref, b_ref, y_ref, st_ref, xp_ref):
    # x_ref : (B, 4, Hc, Wc*Cin)  — the 4 = 2x2 pool-window positions, packed on
    #         the host so the pooled result lands directly in the conv's
    #         lane-dense layout (no in-kernel relayout).
    B, _, Hc, K = x_ref.shape
    v = x_ref[...]
    pooled = jnp.maximum(jnp.maximum(v[:, 0], v[:, 1]),
                         jnp.maximum(v[:, 2], v[:, 3]))       # (B, Hc, Wc*Cin)

    # zero ONLY the 1-row H halo; the interior is fully overwritten every step.
    zrow = jnp.zeros((B, 1, K), xp_ref.dtype)
    xp_ref[:, 0:1, :] = zrow
    xp_ref[:, Hc + 1:Hc + 2, :] = zrow
    xp_ref[:, 1:Hc + 1, :] = pooled

    acc = _band_conv(xp_ref, w_ref, b_ref, mxu_dtype)         # (B*Hc, Wc*C1) f32
    _store_conv_block(acc, y_ref, st_ref)


def _bn_act_conv_kernel(mxu_dtype, y_ref, sc_ref, bi_ref, w_ref, b_ref,
                        o_ref, st_ref, xp_ref):
    # y_ref : (B, Hc, Wc*C1) raw conv1 output;  sc/bi : (1, Wc*C1) lane-tiled BN1
    B, Hc, K = y_ref.shape

    # fused BN1 affine + LeakyReLU (f32 elementwise; no extra HBM round trip)
    a = y_ref[...] * sc_ref[...] + bi_ref[...]
    a = jnp.where(a >= 0, a, _SLOPE * a)

    zrow = jnp.zeros((B, 1, K), xp_ref.dtype)
    xp_ref[:, 0:1, :] = zrow
    xp_ref[:, Hc + 1:Hc + 2, :] = zrow
    xp_ref[:, 1:Hc + 1, :] = a                                # lane-dense copy

    acc = _band_conv(xp_ref, w_ref, b_ref, mxu_dtype)         # (B*Hc, Wc*C2) f32
    _store_conv_block(acc, o_ref, st_ref)


# ------------------------------ host helpers -----------------------------------

def _band_weights(w_hwio, wc):
    """(3,3,Ci,Co) HWIO conv weights -> (3, wc*Ci, wc*Co) block-banded matrices.

    big[di][(w+dj-1)*Ci + ci, w*Co + co] = w[di, dj, ci, co]  for 0 <= w+dj-1 < wc,
    so a padding=1 3x3 conv over the lane-dense (rows, wc*Ci) activation layout is
    sum_di  rows_shifted_by_di @ big[di];  W-padding lives in the zero blocks.
    """
    return jnp.stack([
        sum(jnp.kron(jnp.eye(wc, k=1 - dj, dtype=w_hwio.dtype), w_hwio[di, dj])
            for dj in range(3))
        for di in range(3)])


def _tile_lanes(v, wc):
    # per-channel vector -> (1, wc*C), matching the lane index  w*C + c
    return jnp.tile(v, (wc,)).reshape(1, wc * v.shape[0])


def _bn_scale_bias(stats, gamma, beta, wc, count, eps=_EPS):
    # stats: (G, 2, wc*C) packed per-step partials (sum / sumsq per (w, c) lane)
    C = gamma.shape[0]
    tot = jnp.sum(stats[:, 0, :].reshape(-1, wc, C), axis=(0, 1))
    totsq = jnp.sum(stats[:, 1, :].reshape(-1, wc, C), axis=(0, 1))
    mean = tot / count
    var = totsq / count - mean * mean          # biased variance (train-mode BN)
    # TODO(synk): one-pass E[x^2]-E[x]^2 can cancel for very large N*Hc*Wc or
    #             |mean| >> std; switch to a centered/Welford combine if scaled up.
    inv = jax.lax.rsqrt(var + eps)
    scale = gamma * inv
    bias = beta - mean * scale
    return scale, bias


def _pick_block_n(n):
    # Keep >= 2 grid steps when possible (feeds both v7x TensorCores via the
    # "parallel" axis); the per-step batch block B amortizes pipeline overhead
    # and fills MXU rows on v5e/v6e as well.
    if n >= 2 and n % 2 == 0:
        return n // 2
    return 1 if n > 1 else n


# ------------------------------ forward wrapper ---------------------------------

def down_forward(x_nchw, params, *, block_n=None, mxu_dtype=jnp.float32):
    """PyTorch-facing wrapper: NCHW in, NCHW out (MaxPool2d(2) + double_conv)."""
    N, Cin, H, W = x_nchw.shape
    assert H % 2 == 0 and W % 2 == 0
    Hc, Wc = H // 2, W // 2
    C1 = params["w1"].shape[-1]
    C2 = params["w2"].shape[-1]
    count = N * Hc * Wc
    f32 = jnp.float32

    B = _pick_block_n(N) if block_n is None else block_n
    assert N % B == 0
    G = N // B

    # NCHW -> NHWC, then pack the 2x2 pool window into an explicit dim of 4 with
    # a lane-dense (Wc*Cin) minor dim (one-time XLA transpose, fused with the
    # NCHW->NHWC transpose).
    x_nhwc = jnp.transpose(x_nchw, (0, 2, 3, 1)).astype(f32)
    x_pk = (x_nhwc.reshape(N, Hc, 2, Wc, 2, Cin)
                  .transpose(0, 2, 4, 1, 3, 5)
                  .reshape(N, 4, Hc, Wc * Cin))

    w1b = _band_weights(params["w1"].astype(f32), Wc).astype(mxu_dtype)  # (3, Wc*Cin, Wc*C1)
    w2b = _band_weights(params["w2"].astype(f32), Wc).astype(mxu_dtype)  # (3, Wc*C1,  Wc*C2)
    b1t = _tile_lanes(params["b1"].astype(f32), Wc)
    b2t = _tile_lanes(params["b2"].astype(f32), Wc)

    # --- K1: maxpool + conv1 (+ packed BN1 partial stats) ------------------------
    k1_bytes = _block_bytes(
        ((B, 4, Hc, Wc * Cin), f32), ((3, Wc * Cin, Wc * C1), mxu_dtype),
        ((1, Wc * C1), f32), ((B, Hc, Wc * C1), f32), ((1, 2, Wc * C1), f32),
        ((B, Hc + 2, Wc * Cin), f32))
    y1, st1 = pl.pallas_call(
        functools.partial(_pool_conv_kernel, mxu_dtype),
        grid=(G,),
        in_specs=[
            pl.BlockSpec((B, 4, Hc, Wc * Cin), lambda n: (n, 0, 0, 0)),
            pl.BlockSpec((3, Wc * Cin, Wc * C1), lambda n: (0, 0, 0)),
            pl.BlockSpec((1, Wc * C1), lambda n: (0, 0)),
        ],
        out_specs=(
            pl.BlockSpec((B, Hc, Wc * C1), lambda n: (n, 0, 0)),
            pl.BlockSpec((1, 2, Wc * C1), lambda n: (n, 0, 0)),
        ),
        out_shape=(
            jax.ShapeDtypeStruct((N, Hc, Wc * C1), f32),
            jax.ShapeDtypeStruct((G, 2, Wc * C1), f32),
        ),
        scratch_shapes=[pltpu.VMEM((B, Hc + 2, Wc * Cin), f32)],
        compiler_params=_cparams(k1_bytes),
    )(x_pk, w1b, b1t)

    sc1, bi1 = _bn_scale_bias(st1, params["g1"], params["be1"], Wc, count)
    sc1_t, bi1_t = _tile_lanes(sc1, Wc), _tile_lanes(bi1, Wc)

    # --- K2: BN1 affine + LeakyReLU + conv2 (+ packed BN2 partial stats) ---------
    k2_bytes = _block_bytes(
        ((B, Hc, Wc * C1), f32), ((1, Wc * C1), f32), ((1, Wc * C1), f32),
        ((3, Wc * C1, Wc * C2), mxu_dtype), ((1, Wc * C2), f32),
        ((B, Hc, Wc * C2), f32), ((1, 2, Wc * C2), f32),
        ((B, Hc + 2, Wc * C1), f32))
    y2, st2 = pl.pallas_call(
        functools.partial(_bn_act_conv_kernel, mxu_dtype),
        grid=(G,),
        in_specs=[
            pl.BlockSpec((B, Hc, Wc * C1), lambda n: (n, 0, 0)),
            pl.BlockSpec((1, Wc * C1), lambda n: (0, 0)),
            pl.BlockSpec((1, Wc * C1), lambda n: (0, 0)),
            pl.BlockSpec((3, Wc * C1, Wc * C2), lambda n: (0, 0, 0)),
            pl.BlockSpec((1, Wc * C2), lambda n: (0, 0)),
        ],
        out_specs=(
            pl.BlockSpec((B, Hc, Wc * C2), lambda n: (n, 0, 0)),
            pl.BlockSpec((1, 2, Wc * C2), lambda n: (n, 0, 0)),
        ),
        out_shape=(
            jax.ShapeDtypeStruct((N, Hc, Wc * C2), f32),
            jax.ShapeDtypeStruct((G, 2, Wc * C2), f32),
        ),
        scratch_shapes=[pltpu.VMEM((B, Hc + 2, Wc * C1), f32)],
        compiler_params=_cparams(k2_bytes),
    )(y1, sc1_t, bi1_t, w2b, b2t)

    sc2, bi2 = _bn_scale_bias(st2, params["g2"], params["be2"], Wc, count)

    # --- tail: BN2 affine + LeakyReLU, fused by XLA with the NHWC->NCHW transpose
    #     (replaces the former K3 Pallas kernel; ~40% less tail HBM traffic) ------
    out = y2.reshape(N, Hc, Wc, C2) * sc2 + bi2
    out = jnp.where(out >= 0, out, _SLOPE * out)
    return jnp.transpose(out, (0, 3, 1, 2))


# ------------------------------ reference ---------------------------------------

def _reference(x_nchw, params, eps=_EPS, slope=_SLOPE):
    # Pure-JAX reference mirroring nn.MaxPool2d(2) + double_conv (train-mode BN).
    x = jnp.transpose(x_nchw, (0, 2, 3, 1))
    N, H, W, C = x.shape
    x = jnp.max(x.reshape(N, H // 2, 2, W // 2, 2, C), axis=(2, 4))
    for (w, b, g, be) in [(params["w1"], params["b1"], params["g1"], params["be1"]),
                          (params["w2"], params["b2"], params["g2"], params["be2"])]:
        x = jax.lax.conv_general_dilated(
            x, w, window_strides=(1, 1), padding=((1, 1), (1, 1)),
            dimension_numbers=("NHWC", "HWIO", "NHWC")) + b
        mean = jnp.mean(x, axis=(0, 1, 2), keepdims=True)
        var = jnp.mean((x - mean) ** 2, axis=(0, 1, 2), keepdims=True)
        x = (x - mean) * jax.lax.rsqrt(var + eps) * g + be
        x = jnp.where(x >= 0, x, slope * x)
    return jnp.transpose(x, (0, 3, 1, 2))


if __name__ == "__main__":
    key = jax.random.PRNGKey(0)
    # Wc*C1 = Wc*C2 = 8*16 = 128 -> fully lane-dense slabs; N=4 -> batch block
    # B=2 per grid step with a 2-step "parallel" grid (feeds both v7x TCs).
    N, Cin, Cout, H, W = 4, 4, 16, 16, 16
    k1, k2, k3, k4, k5, k6, k7, k8, kx = jax.random.split(key, 9)

    # Synthetic params matching down(in_ch=4, out_ch=16): conv weights in HWIO,
    # BatchNorm affine params perturbed from defaults to exercise the affine path.
    params = {
        "w1": jax.random.normal(k1, (3, 3, Cin, Cout), jnp.float32) * 0.1,
        "b1": jax.random.normal(k2, (Cout,), jnp.float32) * 0.1,
        "g1": 1.0 + 0.1 * jax.random.normal(k3, (Cout,), jnp.float32),
        "be1": 0.1 * jax.random.normal(k4, (Cout,), jnp.float32),
        "w2": jax.random.normal(k5, (3, 3, Cout, Cout), jnp.float32) * 0.1,
        "b2": jax.random.normal(k6, (Cout,), jnp.float32) * 0.1,
        "g2": 1.0 + 0.1 * jax.random.normal(k7, (Cout,), jnp.float32),
        "be2": 0.1 * jax.random.normal(k8, (Cout,), jnp.float32),
    }
    x = jax.random.normal(kx, (N, Cin, H, W), jnp.float32)

    ref = jax.block_until_ready(_reference(x, params))

    # f32 MXU-operand path: bit-for-bit comparable with the f32 reference.
    out = jax.block_until_ready(down_forward(x, params))
    assert out.shape == (N, Cout, H // 2, W // 2)
    np.testing.assert_allclose(np.asarray(out), np.asarray(ref), rtol=1e-4, atol=1e-4)

    # bf16 MXU-operand path (perf-review recommendation for realistic channel
    # counts); accumulation stays f32, tolerance reflects bf16 operand rounding.
    out_bf = jax.block_until_ready(down_forward(x, params, mxu_dtype=jnp.bfloat16))
    np.testing.assert_allclose(np.asarray(out_bf), np.asarray(ref), rtol=5e-2, atol=5e-2)

    print("KERNEL_OK")
</pallas_src>

<mosaic_0001>
module attributes {stable_mosaic.version = 11 : i64} {
  func.func @_pool_conv_kernel(%arg0: i32, %arg1: memref<2x4x8x32xf32, #tpu.memory_space<vmem>>, %arg2: memref<3x32x128xf32, #tpu.memory_space<vmem>>, %arg3: memref<1x128xf32, #tpu.memory_space<vmem>>, %arg4: memref<2x8x128xf32, #tpu.memory_space<vmem>>, %arg5: memref<1x2x128xf32, #tpu.memory_space<vmem>>, %arg6: memref<2x10x32xf32, #tpu.memory_space<vmem>>) attributes {dimension_semantics = [#tpu.dimension_semantics<parallel>], iteration_bounds = array<i64: 2>, scalar_prefetch = 0 : i64, scratch_operands = 1 : i64, tpu.core_type = #tpu.core_type<tc>, window_params = [{transform_indices = @transform_0, window_bounds = array<i64: 2, 4, 8, 32>}, {pipeline_mode = #tpu.pipeline_mode<synchronous>, transform_indices = @transform_1, window_bounds = array<i64: 3, 32, 128>}, {pipeline_mode = #tpu.pipeline_mode<synchronous>, transform_indices = @transform_2, window_bounds = array<i64: 1, 128>}, {transform_indices = @transform_3, window_bounds = array<i64: 2, 8, 128>}, {transform_indices = @transform_4, window_bounds = array<i64: 1, 2, 128>}]} {
    %c0 = arith.constant 0 : index
    %c0_0 = arith.constant 0 : index
    %c0_1 = arith.constant 0 : index
    %c0_2 = arith.constant 0 : index
    %0 = vector.load %arg1[%c0, %c0_0, %c0_1, %c0_2] : memref<2x4x8x32xf32, #tpu.memory_space<vmem>>, vector<2x4x8x32xf32>
    %1 = vector.extract_strided_slice %0 {offsets = [0, 0, 0, 0], sizes = [2, 1, 8, 32], strides = [1, 1, 1, 1]} : vector<2x4x8x32xf32> to vector<2x1x8x32xf32>
    %2 = vector.shape_cast %1 : vector<2x1x8x32xf32> to vector<2x8x32xf32>
    %3 = vector.extract_strided_slice %0 {offsets = [0, 1, 0, 0], sizes = [2, 1, 8, 32], strides = [1, 1, 1, 1]} : vector<2x4x8x32xf32> to vector<2x1x8x32xf32>
    %4 = vector.shape_cast %3 : vector<2x1x8x32xf32> to vector<2x8x32xf32>
    %5 = arith.maximumf %2, %4 : vector<2x8x32xf32>
    %6 = vector.extract_strided_slice %0 {offsets = [0, 2, 0, 0], sizes = [2, 1, 8, 32], strides = [1, 1, 1, 1]} : vector<2x4x8x32xf32> to vector<2x1x8x32xf32>
    %7 = vector.shape_cast %6 : vector<2x1x8x32xf32> to vector<2x8x32xf32>
    %8 = vector.extract_strided_slice %0 {offsets = [0, 3, 0, 0], sizes = [2, 1, 8, 32], strides = [1, 1, 1, 1]} : vector<2x4x8x32xf32> to vector<2x1x8x32xf32>
    %9 = vector.shape_cast %8 : vector<2x1x8x32xf32> to vector<2x8x32xf32>
    %10 = arith.maximumf %7, %9 : vector<2x8x32xf32>
    %11 = arith.maximumf %5, %10 : vector<2x8x32xf32>
    %cst = arith.constant 0.000000e+00 : f32
    %12 = vector.broadcast %cst : f32 to vector<2x1x32xf32>
    %c0_3 = arith.constant 0 : index
    %c0_4 = arith.constant 0 : index
    %c0_5 = arith.constant 0 : index
    %13 = vector.load %arg6[%c0_3, %c0_4, %c0_5] : memref<2x10x32xf32, #tpu.memory_space<vmem>>, vector<2x1x32xf32>
    tpu.vector_store %arg6[%c0_3, %c0_4, %c0_5], %12 {strides = array<i32>} : memref<2x10x32xf32, #tpu.memory_space<vmem>>, vector<2x1x32xf32>,
    %c0_6 = arith.constant 0 : index
    %c9 = arith.constant 9 : index
    %c0_7 = arith.constant 0 : index
    %14 = vector.load %arg6[%c0_6, %c9, %c0_7] : memref<2x10x32xf32, #tpu.memory_space<vmem>>, vector<2x1x32xf32>
    tpu.vector_store %arg6[%c0_6, %c9, %c0_7], %12 {strides = array<i32>} : memref<2x10x32xf32, #tpu.memory_space<vmem>>, vector<2x1x32xf32>,
    %c0_8 = arith.constant 0 : index
    %c1 = arith.constant 1 : index
    %c0_9 = arith.constant 0 : index
    %15 = vector.load %arg6[%c0_8, %c1, %c0_9] : memref<2x10x32xf32, #tpu.memory_space<vmem>>, vector<2x8x32xf32>
    tpu.vector_store %arg6[%c0_8, %c1, %c0_9], %11 {strides = array<i32>} : memref<2x10x32xf32, #tpu.memory_space<vmem>>, vector<2x8x32xf32>,
    %c0_10 = arith.constant 0 : index
    %c0_11 = arith.constant 0 : index
    %c0_12 = arith.constant 0 : index
    %16 = vector.load %arg6[%c0_10, %c0_11, %c0_12] : memref<2x10x32xf32, #tpu.memory_space<vmem>>, vector<2x8x32xf32>
    %17 = vector.shape_cast %16 : vector<2x8x32xf32> to vector<16x32xf32>
    %c0_13 = arith.constant 0 : index
    %c0_14 = arith.constant 0 : index
    %c0_15 = arith.constant 0 : index
    %18 = vector.load %arg2[%c0_13, %c0_14, %c0_15] : memref<3x32x128xf32, #tpu.memory_space<vmem>>, vector<1x32x128xf32>
    %19 = vector.shape_cast %18 : vector<1x32x128xf32> to vector<32x128xf32>
    %cst_16 = arith.constant dense<0.000000e+00> : vector<16x128xf32>
    %20 = tpu.matmul %17, %19, %cst_16 {dimension_numbers = #tpu.dot_dimension_numbers<[1], [0], [0], [1], [0, 0, 1, 1], [], []>} : vector<16x32xf32>, vector<32x128xf32>, vector<16x128xf32> -> vector<16x128xf32>
    %c0_17 = arith.constant 0 : index
    %c1_18 = arith.constant 1 : index
    %c0_19 = arith.constant 0 : index
    %21 = vector.load %arg6[%c0_17, %c1_18, %c0_19] : memref<2x10x32xf32, #tpu.memory_space<vmem>>, vector<2x8x32xf32>
    %22 = vector.shape_cast %21 : vector<2x8x32xf32> to vector<16x32xf32>
    %c1_20 = arith.constant 1 : index
    %c0_21 = arith.constant 0 : index
    %c0_22 = arith.constant 0 : index
    %23 = vector.load %arg2[%c1_20, %c0_21, %c0_22] : memref<3x32x128xf32, #tpu.memory_space<vmem>>, vector<1x32x128xf32>
    %24 = vector.shape_cast %23 : vector<1x32x128xf32> to vector<32x128xf32>
    %cst_23 = arith.constant dense<0.000000e+00> : vector<16x128xf32>
    %25 = tpu.matmul %22, %24, %cst_23 {dimension_numbers = #tpu.dot_dimension_numbers<[1], [0], [0], [1], [0, 0, 1, 1], [], []>} : vector<16x32xf32>, vector<32x128xf32>, vector<16x128xf32> -> vector<16x128xf32>
    %26 = arith.addf %20, %25 : vector<16x128xf32>
    %c0_24 = arith.constant 0 : index
    %c2 = arith.constant 2 : index
    %c0_25 = arith.constant 0 : index
    %27 = vector.load %arg6[%c0_24, %c2, %c0_25] : memref<2x10x32xf32, #tpu.memory_space<vmem>>, vector<2x8x32xf32>
    %28 = vector.shape_cast %27 : vector<2x8x32xf32> to vector<16x32xf32>
    %c2_26 = arith.constant 2 : index
    %c0_27 = arith.constant 0 : index
    %c0_28 = arith.constant 0 : index
    %29 = vector.load %arg2[%c2_26, %c0_27, %c0_28] : memref<3x32x128xf32, #tpu.memory_space<vmem>>, vector<1x32x128xf32>
    %30 = vector.shape_cast %29 : vector<1x32x128xf32> to vector<32x128xf32>
    %cst_29 = arith.constant dense<0.000000e+00> : vector<16x128xf32>
    %31 = tpu.matmul %28, %30, %cst_29 {dimension_numbers = #tpu.dot_dimension_numbers<[1], [0], [0], [1], [0, 0, 1, 1], [], []>} : vector<16x32xf32>, vector<32x128xf32>, vector<16x128xf32> -> vector<16x128xf32>
    %32 = arith.addf %26, %31 : vector<16x128xf32>
    %c0_30 = arith.constant 0 : index
    %c0_31 = arith.constant 0 : index
    %33 = vector.load %arg3[%c0_30, %c0_31] : memref<1x128xf32, #tpu.memory_space<vmem>>, vector<1x128xf32>
    %34 = vector.broadcast %33 : vector<1x128xf32> to vector<16x128xf32>
    %35 = arith.addf %32, %34 : vector<16x128xf32>
    %36 = vector.shape_cast %35 : vector<16x128xf32> to vector<2x8x128xf32>
    %c0_32 = arith.constant 0 : index
    %c0_33 = arith.constant 0 : index
    %c0_34 = arith.constant 0 : index
    %37 = vector.load %arg4[%c0_32, %c0_33, %c0_34] : memref<2x8x128xf32, #tpu.memory_space<vmem>>, vector<2x8x128xf32>
    tpu.vector_store %arg4[%c0_32, %c0_33, %c0_34], %36 {strides = array<i32>} : memref<2x8x128xf32, #tpu.memory_space<vmem>>, vector<2x8x128xf32>,
    %cst_35 = arith.constant dense<0.000000e+00> : vector<128xf32>
    %38 = vector.multi_reduction <add>, %35, %cst_35 [0] : vector<16x128xf32> to vector<128xf32>
    %39 = vector.shape_cast %38 : vector<128xf32> to vector<1x128xf32>
    %40 = arith.mulf %35, %35 : vector<16x128xf32>
    %cst_36 = arith.constant dense<0.000000e+00> : vector<128xf32>
    %41 = vector.multi_reduction <add>, %40, %cst_36 [0] : vector<16x128xf32> to vector<128xf32>
    %42 = vector.shape_cast %41 : vector<128xf32> to vector<1x128xf32>
    %43 = tpu.concatenate %39, %42 in 0 : vector<1x128xf32>, vector<1x128xf32> -> vector<2x128xf32>
    %44 = vector.shape_cast %43 : vector<2x128xf32> to vector<1x2x128xf32>
    %c0_37 = arith.constant 0 : index
    %c0_38 = arith.constant 0 : index
    %c0_39 = arith.constant 0 : index
    %45 = vector.load %arg5[%c0_37, %c0_38, %c0_39] : memref<1x2x128xf32, #tpu.memory_space<vmem>>, vector<1x2x128xf32>
    tpu.vector_store %arg5[%c0_37, %c0_38, %c0_39], %44 {strides = array<i32>} : memref<1x2x128xf32, #tpu.memory_space<vmem>>, vector<1x2x128xf32>,
    return
  }
  func.func @transform_0(%arg0: i32) -> (i32, i32, i32, i32) {
    %c0_i32 = arith.constant 0 : i32
    %c0_i32_0 = arith.constant 0 : i32
    %c0_i32_1 = arith.constant 0 : i32
    %c0_i32_2 = arith.constant 0 : i32
    return %arg0, %c0_i32, %c0_i32_0, %c0_i32_1 : i32, i32, i32, i32
  }
  func.func @transform_1(%arg0: i32) -> (i32, i32, i32) {
    %c0_i32 = arith.constant 0 : i32
    %c0_i32_0 = arith.constant 0 : i32
    %c0_i32_1 = arith.constant 0 : i32
    %c0_i32_2 = arith.constant 0 : i32
    return %c0_i32, %c0_i32_0, %c0_i32_1 : i32, i32, i32
  }
  func.func @transform_2(%arg0: i32) -> (i32, i32) {
    %c0_i32 = arith.constant 0 : i32
    %c0_i32_0 = arith.constant 0 : i32
    %c0_i32_1 = arith.constant 0 : i32
    return %c0_i32, %c0_i32_0 : i32, i32
  }
  func.func @transform_3(%arg0: i32) -> (i32, i32, i32) {
    %c0_i32 = arith.constant 0 : i32
    %c0_i32_0 = arith.constant 0 : i32
    %c0_i32_1 = arith.constant 0 : i32
    return %arg0, %c0_i32, %c0_i32_0 : i32, i32, i32
  }
  func.func @transform_4(%arg0: i32) -> (i32, i32, i32) {
    %c0_i32 = arith.constant 0 : i32
    %c0_i32_0 = arith.constant 0 : i32
    %c0_i32_1 = arith.constant 0 : i32
    return %arg0, %c0_i32, %c0_i32_0 : i32, i32, i32
  }
}

</mosaic_0001>

<bundles_post_ra>
// kernel: tpu_custom_call.1
= control target key start
LH: loop header
LB: loop body
LE: loop exit
PB: predicated region body
PF: predicated region fallthrough
CT: control target
= control target key end

     0   :  { %10 = vsyncpa [#allocation4], 0  ;;  %s1036_s0 = inlined_call_operand.hbm [shape: f32[4,4,8,32], index: 0, kind: input, shape index: {}]   ;;  %s1037_s1 = inlined_call_operand.hbm [shape: f32[3,32,128], index: 1, kind: input, shape index: {}]   ;;  %s1038_s2 = inlined_call_operand.vmem [shape: f32[1,128], index: 2, kind: input, shape index: {}]   ;;  %s1039_s3 = inlined_call_operand.hbm [shape: f32[4,8,128], index: 3, kind: output, shape index: {0}]   ;;  %s1040_s4 = inlined_call_operand.hbm [shape: f32[2,2,128], index: 4, kind: output, shape index: {1}]  }
   0x1   :  { %12 = vsyncpa [#allocation4 + $0x1], 0 }
   0x2   :  { %13 = vsyncpa [#allocation7], 0 }
   0x3   :  { %14 = vsyncpa [#allocation5], 0 }
   0x4   :  { %16 = vsyncpa [#allocation5 + $0x1], 0 }
   0x5   :  { %17 = vsyncpa [#allocation10], 0 }
   0x6   :  { %19 = vsyncpa [#allocation10 + $0x1], 0  ;;  %s854_s15 = smov 0   ;;  %s856_s16 = smov 0  }
   0x7   :  { %s858_s17 = smov 0   ;;  %s860_s18 = smov 0  }
   0x8 LB: > { %s875_s19 = sadd.s32 4294967295, %s821_s18   ;;  %s558_s20 = sadd.s32 4294967294, %s821_s18   ;;  %s821_s18 = sphi %s860_s18, %s1050_s18   ;;  %s817_s17 = sphi %s858_s17, %s1049_s17   ;;  %s813_s16 = sphi %s856_s16, %s1048_s16   ;;  %s809_s15 = sphi %s854_s15, %s1047_s15  }
   0x9   : > { %p45_p0 = scmp.ne.s32.totalorder %s813_s16, %s809_s15  ;;  %p46_p1 = scmp.eq.s32.totalorder %s875_s19, 0 }
   0xa   : > { %p111_p2 = scmp.eq.s32.totalorder %s875_s19, 1  ;;  %p117_p3 = scmp.eq.s32.totalorder %s558_s20, 1 }
   0xb   : > { %p884_p4 = por %p46_p1, %p45_p0  ;;  %p559_p5 = scmp.ge.s32.totalorder %s821_s18, 1 }
   0xc   : > { %p889_p6 = por %p117_p3, %p45_p0  ;;  %p150_p7 = scmp.lt.s32.totalorder %s821_s18, 3 }
   0xd   : > { %s161_s25 = sshll.u32 %s1037_s1, 4  ;;  %s823_s27 = smov [#allocation6]   ;;  %s162_s25 = int_to_ptr.hbm [resolvable:$true] %s161_s25 }
   0xe   : > { %p897_p8 = pnand %p559_p5, %p150_p7  ;;  %s163_s28 = sshll.u32 %s823_s27, 4  ;;  %s164_s28 = int_to_ptr.vmem [resolvable:$true] %s163_s28 }
   0xf   : > { %s907_s29 = sadd.s32 1, %s821_s18   ;;  %s824_s30 = smov 128  }
  0x10   : > { %p601_p9 = pneg %p897_p8  ;;  %s825_s5 = smov 8  }
  0x11   : > { %s29_s6 = ssub.s32 %s821_s18, %s907_s29  ;;  %s32_s7 = sadd.s32 1, %s817_s17 }
  0x12   : > { %p602_p10 = pnand %p601_p9, %p46_p1  ;;  %p30_p12 = scmp.eq.s32.totalorder %s29_s6, 0 }
  0x13   : > { %p39_p13 = scmp.ne.s32.totalorder %s817_s17, %s813_s16  ;;  %p40_p0 = scmp.eq.s32.totalorder %s821_s18, 0 }
  0x14   : > { %604 = dma.hbm_to_vmem [thread:$0]  (!%p602_p10), %s162_s25, 1536, %s164_s28, [#allocation7], %s824_s30, %s824_s30, %s825_s5  }
  0x15   : > { %s919_s8 = scalar_select %p30_p12, %s817_s17, %s32_s7  }
  0x16   : > { %p923_p3 = por %p111_p2, %p39_p13  ;;  %p617_p5 = scmp.lt.s32.totalorder %s821_s18, 2 }
  0x17   : > { %s180_s10 = sand.u32 1, %s817_s17   ;;  %s585_s11 = sshll.u32 %s821_s18, 6 }
  0x18   : > { %p41_p7 = por %p40_p0, %p39_p13  ;;  %s562_s12 = sshll.u32 %s180_s10, 6 }
  0x19   : > { %s190_s20 = scalar_lea.hbm %s1036_s0, %s585_s11  ;;  %s184_s24 = scalar_lea.vmem [#allocation3], %s562_s12 }
  0x1a   : > { %s191_s23 = sshll.u32 %s190_s20, 4  ;;  %s193_s25 = sshll.u32 %s184_s24, 4  ;;  %s192_s23 = int_to_ptr.hbm [resolvable:$true] %s191_s23  ;;  %s194_s25 = int_to_ptr.vmem [resolvable:$true] %s193_s25 }
  0x1b   : > { %p933_p9 = pnand %p617_p5, %p41_p7  ;;  %s181_s28 = scalar_lea.sflag [#allocation4], %s180_s10 }
  0x1c   : > { %s689_s6 = sshra.s32 %s192_s23, 4  ;;  %s696_s12 = scalar_lea.hbm %s1036_s0, 128  ;;  %s690_s6 = int_to_ptr.hbm [resolvable:$true] %s689_s6 }
  0x1d   : > { %s691_s7 = scalar_lea.hbm %s690_s6, 64  ;;  %p693_p10 = pneg %p933_p9 }
  0x1e   : > { %p692_p2 = scmp.ne.s32.totalorder %s690_s6, %s691_s7  ;;  %p697_p0 = scmp.lt.s32.totalorder %s690_s6, %s1036_s0 }
  0x1f   : > { %p698_p5 = scmp.lt.s32.totalorder %s696_s12, %s691_s7 }
  0x20   : > { %p694_p12 = pnand %p693_p10, %p692_p2 }
  0x21   : > { %p699_p7 = por %p698_p5, %p697_p0 }
  0x22   : > { %p695_p13 = pneg %p694_p12 }
  0x24   : > { %p700_p11 = pnand %p699_p7, %p695_p13 }
  0x26   : > { %703 = shalt.err (!%p700_p11)
}
  0x27   : > { %608 = dma.hbm_to_vmem [thread:$0]  (!%p933_p9), %s192_s23, 1024, %s194_s25, %s181_s28, %s824_s30, %s824_s30, %s825_s5  }
  0x28   : > { %205 = sbr.rel (%p897_p8) target bundleno = 229 (0xe5), region = 32  ;;  %s953_s10 = sand.u32 (!%p897_p8), 1, %s813_s16  }
  0x29   : > { %s567_s24 = sshll.u32 (!%p897_p8), %s953_s10, 6  ;;  %s208_s6 = scalar_lea.sflag (!%p897_p8), [#allocation4], %s953_s10 }
  0x2a   : > { %s957_s7 = scalar_lea.vmem (!%p897_p8), [#allocation3], %s567_s24 }
  0x2d   : > { %792 = dma.done.wait (%p884_p4), %s208_s6, 1024  }
  0x2e   : > { %794 = vsyncadd (%p884_p4), %s208_s6, 4294966272 }
  0x2f   : > { %796 = dma.done.wait (%p46_p1), [#allocation7], 1536  }
  0x30   : > { %798 = vsyncadd (%p46_p1), [#allocation7], 4294965760  ;;  %vm263_vm0 = vcmask 253952   ;;  %v826_v0 = vmov 0.0   ;;  %v348_v1 = vld [vmem:[#allocation6 + $0x58] sm:$0xff]  ;;  %v347_v2 = vld [vmem:[#allocation6 + $0x50] sm:$0xff] }
  0x31   : > { %266 = vst.msk [vmem:[#allocation2 + $0x9] sm:$0x1] %vm263_vm0, %v826_v0  ;;  %v283_v3 = vld [vmem:[#allocation6 + $0x38] sm:$0xff]  ;;  %367 = vmatpush.msra.mxu2 %v348_v1  ;;  %v346_v5 = vld [vmem:[#allocation6 + $0x48] sm:$0xff]  ;;  %v282_v6 = vld [vmem:[#allocation6 + $0x30] sm:$0xff]  ;;  %vm268_vm1 = vcmask 261120  }
  0x32   : > { %264 = vst.msk [vmem:[#allocation2] sm:$0x1] %vm263_vm0, %v826_v0  ;;  %302 = vmatpush.msra.mxu0 %v283_v3  ;;  %v276_v4 = vld [vmem:[#allocation6 + $0x18] sm:$0xff]  ;;  %587 = vmatpush.msra.mxu3 %v283_v3  ;;  %v275_v7 = vld [vmem:[#allocation6 + $0x10] sm:$0xff]  ;;  %v345_v8 = vld [vmem:[#allocation6 + $0x40] sm:$0xff]  ;;  %s569_s21 = sshll.u32 %s953_s10, 4 }
  0x33   : > { %265 = vst.msk [vmem:[#allocation2 + $0x10] sm:$0x1] %vm263_vm0, %v826_v0  ;;  %331 = vmatpush.msra.mxu1 %v276_v4  ;;  %v249_v9 = vld [vmem:[%s957_s7] sm:$0xff]  ;;  %368 = vmatpush.msra.mxu2 %v347_v2  ;;  %v250_v10 = vld [vmem:[%s957_s7 + $0x8] sm:$0xff]  ;;  %v251_v11 = vld [vmem:[%s957_s7 + $0x10] sm:$0xff]  ;;  %s586_s5 = sshll.u32 %s875_s19, 4 }
  0x34   : > { %267 = vst.msk [vmem:[#allocation2 + $0x19] sm:$0x1] %vm263_vm0, %v826_v0  ;;  %303 = vmatpush.msra.mxu0 %v282_v6  ;;  %v252_v12 = vld [vmem:[%s957_s7 + $0x18] sm:$0xff]  ;;  %v253_v13 = vld [vmem:[%s957_s7 + $0x20] sm:$0xff]  ;;  %v254_v14 = vld [vmem:[%s957_s7 + $0x28] sm:$0xff]  ;;  %v257_v16 = vmax.f32 %v249_v9, %v250_v10  ;;  %588 = vmatpush.msra.mxu3 %v282_v6  ;;  %s239_s23 = scalar_lea.vmem [#allocation8], %s569_s21  ;;  %s424_s28 = scalar_lea.hbm %s1039_s3, %s586_s5 }
  0x35   : > { %332 = vmatpush.msra.mxu1 %v275_v7  ;;  %v255_v15 = vld [vmem:[%s957_s7 + $0x30] sm:$0xff]  ;;  %v259_v17 = vmax.f32 %v251_v11, %v252_v12  ;;  %369 = vmatpush.msra.mxu2 %v346_v5  ;;  %v256_v18 = vld [vmem:[%s957_s7 + $0x38] sm:$0xff]  ;;  %v258_v19 = vmax.f32 %v253_v13, %v254_v14  ;;  %v281_v20 = vld [vmem:[#allocation6 + $0x28] sm:$0xff]  ;;  %s425_s11 = sshll.u32 %s239_s23, 4  ;;  %s427_s13 = sshll.u32 %s424_s28, 4  ;;  %s426_s11 = int_to_ptr.vmem [resolvable:$true] %s425_s11  ;;  %s428_s13 = int_to_ptr.hbm [resolvable:$true] %s427_s13 }
  0x36   : > { %v274_v21 = vld [vmem:[#allocation6 + $0x8] sm:$0xff]  ;;  %v260_v22 = vmax.f32 %v255_v15, %v256_v18  ;;  %304 = vmatpush.msra.mxu0 %v281_v20  ;;  %v280_v24 = vld [vmem:[#allocation6 + $0x20] sm:$0xff]  ;;  %589 = vmatpush.msra.mxu3 %v281_v20  ;;  %s408_s12 = scalar_lea.sflag [#allocation5], %s953_s10  ;;  %s733_s14 = sshra.s32 %s428_s13, 4  ;;  %s734_s14 = int_to_ptr.hbm [resolvable:$true] %s733_s14 }
  0x37   : > { %v261_v23 = vmax.f32 %v257_v16, %v259_v17  ;;  %333 = vmatpush.msra.mxu1 %v274_v21  ;;  %v273_v25 = vld [vmem:[#allocation6] sm:$0xff]  ;;  %370 = vmatpush.msra.mxu2 %v345_v8  ;;  %s735_s20 = scalar_lea.hbm %s734_s14, 16  ;;  %s739_s7 = scalar_lea.hbm %s1039_s3, 32 }
  0x38   : > { %v262_v26 = vmax.f32 %v258_v19, %v260_v22  ;;  %305 = vmatpush.msra.mxu0 %v280_v24  ;;  %590 = vmatpush.msra.mxu3 %v280_v24  ;;  %v658_v36 = vld [vmem:[%s1038_s2] ss:$0 sm:$0xff]  ;;  %p736_p1 = scmp.ne.s32.totalorder %s734_s14, %s735_s20  ;;  %p740_p11 = scmp.lt.s32.totalorder %s734_s14, %s1039_s3 }
  0x39   : > { %269 = vst.msk [vmem:[#allocation2 + $0x1] sm:$0xff] %vm268_vm1, %v261_v23  ;;  %334 = vmatpush.msra.mxu1 %v273_v25  ;;  %p741_p9 = scmp.lt.s32.totalorder %s739_s7, %s735_s20 }
  0x3a   : > { %270 = vst.msk [vmem:[#allocation2 + $0x11] sm:$0xff] %vm268_vm1, %v262_v26  ;;  %p737_p4 = pnand %p736_p1, %p923_p3 }
  0x3b   : > { %p742_p2 = por %p741_p9, %p740_p11 }
  0x3c   : > { %p738_p8 = pneg %p737_p4 }
  0x3e   : > { %p743_p10 = pnand %p742_p2, %p738_p8 }
  0x40   : > { %v342_v27 = vld [vmem:[#allocation2 + $0x2] sm:$0xff] }
  0x41   : > { %v277_v28 = vld [vmem:[#allocation2 + $0x1] sm:$0xff]  ;;  %575 = vmatmul.msk.f32.vlgmr.msra.gmra.mxu2 %vm268_vm1, %v342_v27  ;;  %v278_v30 = vld [vmem:[#allocation2 + $0x11] sm:$0xff] }
  0x42   : > { %v271_v29 = vld [vmem:[#allocation2] sm:$0xff]  ;;  %571 = vmatmul.msk.f32.vlgmr.msra.gmra.mxu0 %vm268_vm1, %v277_v28  ;;  %572 = vmatmul.msk.f32.vlgmr.msra.gmra.mxu3 %vm268_vm1, %v278_v30  ;;  %v343_v31 = vld [vmem:[#allocation2 + $0x12] sm:$0xff] }
  0x43   : > { %573 = vmatmul.msk.f32.vlgmr.msra.gmra.mxu1 %vm268_vm1, %v271_v29  ;;  %v272_v32 = vld [vmem:[#allocation2 + $0x10] sm:$0xff] }
  0x49   : > { %576 = vmatmul.msk.f32.gmra.mxu2 %vm268_vm1, %v343_v31 }
  0x4b   : > { %574 = vmatmul.msk.f32.gmra.mxu1 %vm268_vm1, %v272_v32 }
  0xbf   : > { %v307_v33 = vpop.f32.mrf.mxu0 }
  0xc0   : > { %v336_v34 = vpop.f32.mrf.mxu1 }
  0xc1   : > { %v337_v35 = vadd.f32 %v336_v34, %v307_v33 }
  0xc4   : > { %v372_v37 = vpop.f32.mrf.mxu2 }
  0xc5   : > { %v378_v38 = vadd.f32 %v372_v37, %v337_v35  ;;  %v310_v39 = vpop.f32.mrf.mxu3 }
  0xc7   : > { %v384_v40 = vadd.f32 %v658_v36, %v378_v38 }
  0xc8   : > { %v339_v41 = vpop.f32.mrf.mxu1 }
  0xc9   : > { %386 = vst [vmem:[%s239_s23] sm:$0xff] %v384_v40  ;;  %v340_v42 = vadd.f32 %v339_v41, %v310_v39  ;;  %v395_v46 = vmul.f32 %v384_v40, %v384_v40 }
  0xcc   : > { %v375_v43 = vpop.f32.mrf.mxu2 }
  0xcd   : > { %v379_v44 = vadd.f32 %v375_v43, %v340_v42 }
  0xcf   : > { %v385_v45 = vadd.f32 %v658_v36, %v379_v44 }
  0xd1   : > { %387 = vst [vmem:[%s239_s23 + $0x8] sm:$0xff] %v385_v45  ;;  %v388_v47 = vadd.f32 %v385_v45, %v384_v40  ;;  %v396_v48 = vmul.f32 %v385_v45, %v385_v45 }
  0xd2   : > { %746 = shalt.err (!%p743_p10)
}
  0xd3   : > { %s827_s30 = smov 128   ;;  %s828_s5 = smov 8   ;;  %v389_v49 = vrot.slane %v388_v47, 4  ;;  %v397_v50 = vadd.f32 %v396_v48, %v395_v46  ;;  %vm404_vm2 = vcmask 1040384  }
  0xd4   : > { %597 = dma.vmem_to_hbm [thread:$0]  (%p923_p3), %s426_s11, 256, %s428_s13, %s408_s12, %s827_s30, %s827_s30, %s828_s5  }
  0xd5   : > { %v390_v51 = vadd.f32 %v389_v49, %v388_v47  ;;  %v398_v52 = vrot.slane %v397_v50, 4  ;;  %s570_s23 = sshll.u32 %s953_s10, 1  ;;  %s581_s25 = sshll.u32 %s875_s19, 1 }
  0xd6   : > { %s440_s14 = scalar_lea.hbm %s1040_s4, %s581_s25  ;;  %s246_s11 = scalar_lea.vmem [#allocation9], %s570_s23 }
  0xd7   : > { %v391_v53 = vrot.slane %v390_v51, 2  ;;  %v399_v54 = vadd.f32 %v398_v52, %v397_v50  ;;  %s442_s13 = sshll.u32 %s246_s11, 4  ;;  %s444_s12 = sshll.u32 %s440_s14, 4  ;;  %s443_s13 = int_to_ptr.vmem [resolvable:$true] %s442_s13  ;;  %s445_s12 = int_to_ptr.hbm [resolvable:$true] %s444_s12 }
  0xd8   : > { %s413_s19 = scalar_lea.sflag [#allocation10], %s953_s10  ;;  %s761_s20 = sshra.s32 %s445_s12, 4  ;;  %s762_s20 = int_to_ptr.hbm [resolvable:$true] %s761_s20 }
  0xd9   : > { %v392_v55 = vadd.f32 %v391_v53, %v390_v51  ;;  %v400_v56 = vrot.slane %v399_v54, 2  ;;  %s763_s24 = scalar_lea.hbm %s762_s20, 2  ;;  %s767_s21 = scalar_lea.hbm %s1040_s4, 4 }
  0xda   : > { %p764_p12 = scmp.ne.s32.totalorder %s762_s20, %s763_s24  ;;  %p768_p5 = scmp.lt.s32.totalorder %s762_s20, %s1040_s4 }
  0xdb   : > { %v393_v57 = vrot.slane %v392_v55, 1  ;;  %v401_v58 = vadd.f32 %v400_v56, %v399_v54  ;;  %p769_p7 = scmp.lt.s32.totalorder %s767_s21, %s763_s24 }
  0xdc   : > { %p765_p13 = pnand %p764_p12, %p923_p3 }
  0xdd   : > { %v402_v59 = vrot.slane %v401_v58, 1  ;;  %v394_v60 = vadd.f32 %v393_v57, %v392_v55  ;;  %p770_p1 = por %p769_p7, %p768_p5 }
  0xde   : > { %p766_p0 = pneg %p765_p13 }
  0xdf   : > { %v403_v61 = vadd.f32 %v402_v59, %v401_v58 }
  0xe0   : > { %p771_p4 = pnand %p770_p1, %p766_p0 }
  0xe1   : > { %v405_v62 = vsel %vm404_vm2, %v394_v60, %v403_v61 }
  0xe2   : > { %406 = vst [vmem:[%s246_s11] sm:$0x3] %v405_v62 }
  0xe3   : > { %774 = shalt.err (!%p771_p4)
}
  0xe4   : > { %598 = dma.vmem_to_hbm [thread:$0]  (%p923_p3), %s443_s13, 32, %s445_s12, %s413_s19  }
  0xe5 PF: > { %s456_s10 = sand.u32 1, %s809_s15   ;;  %p1046_p8 = scmp.ge.s32.totalorder %s821_s18, 2 }
  0xe6   : > { %s457_s5 = scalar_lea.sflag [#allocation5], %s456_s10 }
  0xe7   : > { %p610_p11 = pnand %p1046_p8, %p889_p6 }
  0xe9   : > { %p611_p9 = pneg %p610_p11 }
  0xeb   : > { %800 = dma.done.wait (%p611_p9), %s457_s5, 256  }
  0xec   : > { %802 = vsyncadd (%p611_p9), %s457_s5, 4294967040  ;;  %s467_s23 = scalar_lea.sflag [#allocation10], %s456_s10 }
  0xed   : > { %804 = dma.done.wait (%p611_p9), %s467_s23, 32  }
  0xee   : > { %806 = vsyncadd (%p611_p9), %s467_s23, 4294967264  ;;  %p22_p3 = scmp.ge.s32.totalorder %s907_s29, 4   ;;  %s1047_s15 = smov %s813_s16 }
  0xef   : > { %s1048_s16 = smov %s817_s17  ;;  %s1049_s17 = smov %s919_s8 }
  0xf0   : > { %s1050_s18 = smov %s907_s29  ;;  %24 = sbr.rel (!%p22_p3) target bundleno = 8 (0x8), region = 100 }
  0xf5   :  { %473 = vsyncpa [#allocation4], 1 }
  0xf6   :  { %475 = vsyncpa [#allocation4 + $0x1], 1 }
  0xf7   :  { %476 = vsyncpa [#allocation7], 1 }
  0xf8   :  { %477 = vsyncpa [#allocation5], 1 }
  0xf9   :  { %479 = vsyncpa [#allocation5 + $0x1], 1 }
  0xfa   :  { %480 = vsyncpa [#allocation10], 1 }
  0xfb   :  { %482 = vsyncpa [#allocation10 + $0x1], 1 }

</bundles_post_ra>
